<compile_context>
chip_gen: v6e
topology: v6e:2x2x1
jax: 0.10.0
libtpu: 0.0.40
codegen_flags: <defaults>
</compile_context>

<pallas_src>
import functools

import numpy as np
import jax
import jax.numpy as jnp
from jax.experimental import pallas as pl
from jax.experimental.pallas import tpu as pltpu


def _deriv_stencil_kernel(x_ref, o_ref, *, taps, K, Ho, Wo, use_lane_roll):
    """One grid step: valid KxK stencil over a (TNC, H, W) block of planes.

    `taps` are compile-time python floats already scaled by 1/resol; zero taps are
    skipped (no load, no roll, no FMA for them).
    """
    x = x_ref[...]                      # (TNC, H, W) f32 in VMEM
    W = x_ref.shape[-1]

    acc = None

    if use_lane_roll:
        # Hoist the K lane shifts out of the di loop: at most K-1 XLU rolls,
        # each reused across all di.
        shifted = {}
        for dj in range(K):
            if not any(taps[di][dj] != 0.0 for di in range(K)):
                continue
            shifted[dj] = x if dj == 0 else pltpu.roll(
                x, shift=W - dj, axis=x.ndim - 1)
        for di in range(K):
            for dj in range(K):
                w = taps[di][dj]
                if w == 0.0:
                    continue
                term = w * shifted[dj][:, di:di + Ho, :Wo]
                acc = term if acc is None else acc + term
    else:
        for di in range(K):
            for dj in range(K):
                w = taps[di][dj]
                if w == 0.0:
                    continue
                term = w * x[:, di:di + Ho, dj:dj + Wo]
                acc = term if acc is None else acc + term

    if acc is None:                     # degenerate all-zero filter
        acc = jnp.zeros(o_ref.shape, jnp.float32)
    o_ref[...] = acc.astype(o_ref.dtype)


def _pick_tile_nc(NC, H, W, Ho, Wo, budget_bytes):
    """Largest divisor of NC whose double-buffered in+out tile fits the budget;
    prefer >= 2 grid steps so the DMA pipeline actually overlaps (and megacore
    has work to shard)."""
    per_plane = 4 * (H * W + Ho * Wo) * 2           # f32, 2 pipeline buffers each
    cap = max(1, budget_bytes // per_plane)
    divisors = [d for d in range(1, NC + 1) if NC % d == 0]
    fitting = [d for d in divisors if d <= cap] or [1]
    t = max(fitting)
    if t == NC and NC > 1:
        smaller = [d for d in fitting if d < NC]
        if smaller:
            t = max(smaller)
    return t


def make_conv2d_derivative(der_filter, resol, *, vmem_budget_bytes=6 * 1024 * 1024):
    """Build the forward fn of a Conv2dDerivative module.

    der_filter : (1, 1, K, K) (or (K, K)) array-like, frozen at construction time.
    resol      : python float (e.g. dx**2), folded into the taps.
    Returns f(x): (N, 1, H, W) -> (N, 1, H-K+1, W-K+1), matching
    nn.Conv2d(1, 1, K, stride=1, padding=0, bias=False)(x) / resol.
    """
    wf = np.asarray(der_filter, dtype=np.float64)
    K = int(wf.shape[-1])
    wf = wf.reshape(-1, K)
    if wf.shape != (K, K):
        raise ValueError(f"expected a single (1,1,{K},{K}) filter, got shape "
                         f"{np.shape(der_filter)}")
    # Fold 1/resol into the frozen taps -> compile-time scalars for the kernel.
    taps = tuple(tuple(float(v) / float(resol) for v in row) for row in wf)

    @jax.jit
    def forward(x):
        N, C, H, W = x.shape
        if C != 1:
            raise ValueError("Conv2dDerivative is single-channel (C must be 1)")
        Ho, Wo = H - K + 1, W - K + 1
        NC = N * C
        TNC = _pick_tile_nc(NC, H, W, Ho, Wo, vmem_budget_bytes)

        xr = x.reshape(NC, H, W).astype(jnp.float32)
        kernel = functools.partial(
            _deriv_stencil_kernel, taps=taps, K=K, Ho=Ho, Wo=Wo,
            use_lane_roll=(W % 128 == 0))

        out = pl.pallas_call(
            kernel,
            grid=(NC // TNC,),
            in_specs=[pl.BlockSpec((TNC, H, W), lambda i: (i, 0, 0))],
            out_specs=pl.BlockSpec((TNC, Ho, Wo), lambda i: (i, 0, 0)),
            out_shape=jax.ShapeDtypeStruct((NC, Ho, Wo), jnp.float32),
            compiler_params=pltpu.CompilerParams(
                dimension_semantics=("parallel",)),
        )(xr)
        return out.reshape(N, C, Ho, Wo).astype(x.dtype)

    return forward


if __name__ == "__main__":
    # Shapes consistent with the module: batch=2, 1 channel, 16x16 grid, 3x3
    # Laplacian DerFilter, resol = dx**2.
    N, C, H, W = 2, 1, 16, 16
    dx = 1.0 / 16.0
    resol = dx * dx
    lap = np.array([[[[0.0,  1.0, 0.0],
                      [1.0, -4.0, 1.0],
                      [0.0,  1.0, 0.0]]]], dtype=np.float32)

    key = jax.random.PRNGKey(0)
    k1, k2, k3 = jax.random.split(key, 3)
    x = jax.random.normal(k1, (N, C, H, W), jnp.float32)

    def ref_conv(xx, filt, rr):
        return jax.lax.conv_general_dilated(
            xx, jnp.asarray(filt, jnp.float32), window_strides=(1, 1),
            padding="VALID", dimension_numbers=("NCHW", "OIHW", "NCHW")) / rr

    # 1) Canonical frozen Laplacian filter (4 of the 9 taps are zero and skipped).
    laplace_op = make_conv2d_derivative(lap, resol)
    out = laplace_op(x)
    jax.block_until_ready(out)
    assert out.shape == (N, C, H - 2, W - 2)
    assert bool(jnp.all(jnp.isfinite(out)))
    np.testing.assert_allclose(np.asarray(out),
                               np.asarray(ref_conv(x, lap, resol)),
                               rtol=1e-4, atol=1e-3)

    # 2) Dense random 3x3 filter, different batch -> exercises all 9 taps and a
    #    different NC tiling (grid of 3).
    dense = np.asarray(jax.random.normal(k2, (1, 1, 3, 3), jnp.float32))
    x2 = jax.random.normal(k3, (3, 1, 16, 16), jnp.float32)
    dense_op = make_conv2d_derivative(dense, 0.5)
    out2 = dense_op(x2)
    jax.block_until_ready(out2)
    np.testing.assert_allclose(np.asarray(out2),
                               np.asarray(ref_conv(x2, dense, 0.5)),
                               rtol=1e-4, atol=1e-3)

    print("KERNEL_OK")
</pallas_src>

<mosaic_0001>
module attributes {stable_mosaic.version = 11 : i64} {
  func.func @_deriv_stencil_kernel(%arg0: i32, %arg1: memref<1x16x16xf32, #tpu.memory_space<vmem>>, %arg2: memref<1x14x14xf32, #tpu.memory_space<vmem>>) attributes {dimension_semantics = [#tpu.dimension_semantics<parallel>], iteration_bounds = array<i64: 2>, scalar_prefetch = 0 : i64, scratch_operands = 0 : i64, tpu.core_type = #tpu.core_type<tc>, window_params = [{transform_indices = @transform_0, window_bounds = array<i64: 1, 16, 16>}, {transform_indices = @transform_1, window_bounds = array<i64: 1, 14, 14>}]} {
    %c0 = arith.constant 0 : index
    %c0_0 = arith.constant 0 : index
    %c0_1 = arith.constant 0 : index
    %0 = vector.load %arg1[%c0, %c0_0, %c0_1] : memref<1x16x16xf32, #tpu.memory_space<vmem>>, vector<1x16x16xf32>
    %1 = vector.extract_strided_slice %0 {offsets = [0, 0, 1], sizes = [1, 14, 14], strides = [1, 1, 1]} : vector<1x16x16xf32> to vector<1x14x14xf32>
    %cst = arith.constant 2.560000e+02 : f32
    %2 = vector.broadcast %cst : f32 to vector<1x14x14xf32>
    %3 = arith.mulf %2, %1 : vector<1x14x14xf32>
    %4 = vector.extract_strided_slice %0 {offsets = [0, 1, 0], sizes = [1, 14, 14], strides = [1, 1, 1]} : vector<1x16x16xf32> to vector<1x14x14xf32>
    %cst_2 = arith.constant 2.560000e+02 : f32
    %5 = vector.broadcast %cst_2 : f32 to vector<1x14x14xf32>
    %6 = arith.mulf %5, %4 : vector<1x14x14xf32>
    %7 = arith.addf %3, %6 : vector<1x14x14xf32>
    %8 = vector.extract_strided_slice %0 {offsets = [0, 1, 1], sizes = [1, 14, 14], strides = [1, 1, 1]} : vector<1x16x16xf32> to vector<1x14x14xf32>
    %cst_3 = arith.constant -1.024000e+03 : f32
    %9 = vector.broadcast %cst_3 : f32 to vector<1x14x14xf32>
    %10 = arith.mulf %9, %8 : vector<1x14x14xf32>
    %11 = arith.addf %7, %10 : vector<1x14x14xf32>
    %12 = vector.extract_strided_slice %0 {offsets = [0, 1, 2], sizes = [1, 14, 14], strides = [1, 1, 1]} : vector<1x16x16xf32> to vector<1x14x14xf32>
    %cst_4 = arith.constant 2.560000e+02 : f32
    %13 = vector.broadcast %cst_4 : f32 to vector<1x14x14xf32>
    %14 = arith.mulf %13, %12 : vector<1x14x14xf32>
    %15 = arith.addf %11, %14 : vector<1x14x14xf32>
    %16 = vector.extract_strided_slice %0 {offsets = [0, 2, 1], sizes = [1, 14, 14], strides = [1, 1, 1]} : vector<1x16x16xf32> to vector<1x14x14xf32>
    %cst_5 = arith.constant 2.560000e+02 : f32
    %17 = vector.broadcast %cst_5 : f32 to vector<1x14x14xf32>
    %18 = arith.mulf %17, %16 : vector<1x14x14xf32>
    %19 = arith.addf %15, %18 : vector<1x14x14xf32>
    %c0_6 = arith.constant 0 : index
    %c0_7 = arith.constant 0 : index
    %c0_8 = arith.constant 0 : index
    %20 = vector.load %arg2[%c0_6, %c0_7, %c0_8] : memref<1x14x14xf32, #tpu.memory_space<vmem>>, vector<1x14x14xf32>
    tpu.vector_store %arg2[%c0_6, %c0_7, %c0_8], %19 {strides = array<i32>} : memref<1x14x14xf32, #tpu.memory_space<vmem>>, vector<1x14x14xf32>,
    return
  }
  func.func @transform_0(%arg0: i32) -> (i32, i32, i32) {
    %c0_i32 = arith.constant 0 : i32
    %c0_i32_0 = arith.constant 0 : i32
    %c0_i32_1 = arith.constant 0 : i32
    return %arg0, %c0_i32, %c0_i32_0 : i32, i32, i32
  }
  func.func @transform_1(%arg0: i32) -> (i32, i32, i32) {
    %c0_i32 = arith.constant 0 : i32
    %c0_i32_0 = arith.constant 0 : i32
    %c0_i32_1 = arith.constant 0 : i32
    return %arg0, %c0_i32, %c0_i32_0 : i32, i32, i32
  }
}

</mosaic_0001>

<bundles_post_ra>
// kernel: forward.1
= control target key start
LH: loop header
LB: loop body
LE: loop exit
PB: predicated region body
PF: predicated region fallthrough
CT: control target
= control target key end

     0   :  { %6 = vsyncpa [#allocation3], 0  ;;  %s498_s0 = inlined_call_operand.hbm [shape: f32[2,16,16], index: 0, kind: input, shape index: {}]   ;;  %s499_s1 = inlined_call_operand.vmem [shape: f32[2,14,14], index: 1, kind: output, shape index: {}]  }
   0x1   :  { %8 = vsyncpa [#allocation3 + $0x1], 0  ;;  %s397_s6 = smov 0   ;;  %s399_s7 = smov 0  }
   0x2   :  { %s401_s8 = smov 0   ;;  %s403_s9 = smov 0  }
   0x3 LB: > { %s416_s10 = sadd.s32 4294967295, %s380_s9   ;;  %s419_s11 = sadd.s32 1, %s380_s9   ;;  %s380_s9 = sphi %s403_s9, %s508_s9   ;;  %s376_s8 = sphi %s401_s8, %s507_s8   ;;  %s372_s7 = sphi %s399_s7, %s506_s7   ;;  %s368_s6 = sphi %s397_s6, %s505_s6  }
   0x4   : > { %s18_s12 = ssub.s32 %s380_s9, %s419_s11  ;;  %s21_s13 = sadd.s32 1, %s376_s8 }
   0x5   : > { %p19_p0 = scmp.eq.s32.totalorder %s18_s12, 0  ;;  %p28_p1 = scmp.ne.s32.totalorder %s376_s8, %s372_s7 }
   0x6   : > { %p29_p2 = scmp.eq.s32.totalorder %s380_s9, 0  ;;  %p34_p3 = scmp.ne.s32.totalorder %s372_s7, %s368_s6 }
   0x7   : > { %s429_s14 = scalar_select %p19_p0, %s376_s8, %s21_s13  }
   0x8   : > { %p30_p4 = por %p29_p2, %p28_p1  ;;  %p35_p5 = scmp.eq.s32.totalorder %s416_s10, 0 }
   0x9   : > { %p281_p6 = scmp.lt.s32.totalorder %s380_s9, 2  ;;  %s84_s16 = sand.u32 1, %s376_s8  }
   0xa   : > { %p433_p7 = por %p35_p5, %p34_p3  ;;  %s264_s17 = sshll.u32 %s84_s16, 4 }
   0xb   : > { %s273_s18 = sshll.u32 %s380_s9, 8  ;;  %s88_s22 = scalar_lea.vmem [#allocation2], %s264_s17 }
   0xc   : > { %s501_s15 = scalar_select %p433_p7, 1, 0 }
   0xd   : > { %s442_s21 = scalar_lea.hbm %s498_s0, %s273_s18  ;;  %s95_s23 = sshll.u32 %s88_s22, 4  ;;  %s444_s23 = int_to_ptr.vmem [resolvable:$true] %s95_s23 }
   0xe   : > { %p446_p8 = pnand %p281_p6, %p30_p4  ;;  %s451_s25 = scalar_lea.sflag [#allocation3], %s84_s16 }
   0xf   : > { %s318_s26 = scalar_lea.hbm %s442_s21, 256  ;;  %s323_s29 = scalar_lea.hbm %s498_s0, 512 }
  0x10   : > { %p319_p10 = scmp.ne.s32.totalorder %s442_s21, %s318_s26  ;;  %p320_p11 = pneg %p446_p8 }
  0x11   : > { %p324_p0 = scmp.lt.s32.totalorder %s442_s21, %s498_s0  ;;  %p325_p1 = scmp.lt.s32.totalorder %s323_s29, %s318_s26 }
  0x12   : > { %p321_p12 = pnand %p320_p11, %p319_p10 }
  0x13   : > { %p326_p2 = por %p325_p1, %p324_p0 }
  0x14   : > { %p322_p13 = pneg %p321_p12 }
  0x16   : > { %p327_p3 = pnand %p326_p2, %p322_p13 }
  0x18   : > { %330 = shalt.err (!%p327_p3)
}
  0x19   : > { %s331_s3 = scalar_lea.vmem %s444_s23, 256  ;;  %s382_s4 = smov [#allocation2]  }
  0x1a   : > { %p332_p4 = scmp.ne.s32.totalorder %s444_s23, %s331_s3  ;;  %s336_s5 = sshll.u32 %s382_s4, 4  ;;  %s337_s5 = int_to_ptr.vmem [resolvable:$false] %s336_s5 }
  0x1b   : > { %s338_s6 = scalar_lea.vmem %s337_s5, 512  ;;  %p339_p10 = scmp.lt.s32.totalorder %s444_s23, %s337_s5 }
  0x1c   : > { %p334_p5 = pnand %p332_p4, %p320_p11  ;;  %p340_p12 = scmp.lt.s32.totalorder %s338_s6, %s331_s3 }
  0x1e   : > { %p335_p6 = pneg %p334_p5  ;;  %p341_p9 = por %p340_p12, %p339_p10 }
  0x20   : > { %p342_p7 = pnand %p341_p9, %p335_p6 }
  0x22   : > { %345 = shalt.err (!%p342_p7)
}
  0x23   : > { %s383_s12 = smov 128   ;;  %s384_s13 = smov 8  }
  0x24   : > { %280 = dma.hbm_to_vmem [thread:$0]  (!%p446_p8), %s442_s21, 256, %s444_s23, %s451_s25, %s383_s12, %s383_s12, %s384_s13  }
  0x25   : > { %p103_p11 = scmp.lt.s32.totalorder %s380_s9, 3  ;;  %p503_p13 = scmp.ge.s32.totalorder %s380_s9, 1 }
  0x27   : > { %p104_p0 = pnand %p503_p13, %p103_p11 }
  0x28   : > { %s109_s16 = sand.u32 (!%p104_p0), 1, %s372_s7   ;;  %p504_p7 = scmp.ne.s32.totalorder (!%p104_p0), %s501_s15, 0 }
  0x29   : > { %107 = sbr.rel (%p104_p0) target bundleno = 296 (0x128), region = 24  ;;  %s268_s17 = sshll.u32 (!%p104_p0), %s109_s16, 4 }
  0x2a   : > { %s110_s18 = scalar_lea.sflag (!%p104_p0), [#allocation3], %s109_s16  ;;  %s113_s19 = scalar_lea.vmem (!%p104_p0), [#allocation2], %s268_s17 }
  0x2e   : > { %363 = dma.done.wait (%p504_p7), %s110_s18, 256  }
  0x2f   : > { %365 = vsyncadd (%p504_p7), %s110_s18, 4294967040  ;;  %v137_v0 = vld [vmem:[%s113_s19] sm:$0xff]  ;;  %v138_v1 = vld [vmem:[%s113_s19 + $0x8] sm:$0xff]  ;;  %vm143_vm0 = vcmask 1046528   ;;  %s385_s9 = smov 1   ;;  %s386_s20 = smov 127  }
  0x30   : > { %v139_v2 = vmul.f32 256.0, %v137_v0  ;;  %v140_v3 = vmul.f32 256.0, %v138_v1  ;;  %v155_v4 = vmul.f32 -1024.0, %v137_v0  ;;  %v156_v5 = vmul.f32 -1024.0, %v138_v1  ;;  %p132_p8 = scmp.lt.s32.totalorder %s416_s10, 1 }
  0x31   : > { %vm174_vm1 = vcmask 1045504   ;;  %vm190_vm2 = vcmask 113664   ;;  %vm192_vm3 = vcmask 111616  }
  0x32   : > { %v144_v6 = vrot.slane %v139_v2, 1  ;;  %v145_v7 = vrot.slane %v140_v3, 1  ;;  %v159_v8 = vrot.slane %v155_v4, 1  ;;  %v160_v9 = vrot.slane %v156_v5, 1  ;;  %s510_s10 = smov (!%p132_p8, %s416_s10), 1 }
  0x33   : > { %v175_v13 = vrot.slane %v139_v2, 2  ;;  %v176_v14 = vrot.slane %v140_v3, 2  ;;  %s274_s15 = sshll.u32 %s510_s10, 4 }
  0x34   : > { %v146_v10 = vsel %vm143_vm0, %v144_v6, %v145_v7  ;;  %v161_v11 = vsel %vm143_vm0, %v159_v8, %v160_v9  ;;  %s136_s23 = scalar_lea.vmem %s499_s1, %s274_s15 }
  0x35   : > { %147 = vrot.lane.b32.xlu0 %v146_v10, %s385_s9  ;;  %166 = vrot.lane.b32.xlu1 %v146_v10, %s386_s20  ;;  %v177_v18 = vsel %vm174_vm1, %v175_v13, %v176_v14 }
  0x39   : > { %149 = vrot.lane.b32.xlu0 %v145_v7, %s385_s9  ;;  %168 = vrot.lane.b32.xlu1 %v145_v7, %s386_s20 }
  0xa7   : > { %v148_v12 = vpop.permute.xlu0 %147  ;;  %v167_v15 = vpop.permute.xlu1 %166 }
  0xa8   : > { %v153_v16 = vadd.f32 %v148_v12, %v139_v2 }
  0xaa   : > { %v164_v17 = vadd.f32 %v161_v11, %v153_v16 }
  0xab   : > { %v150_v19 = vpop.permute.xlu0 %149  ;;  %v169_v22 = vpop.permute.xlu1 %168 }
  0xac   : > { %v172_v20 = vadd.f32 %v167_v15, %v164_v17  ;;  %v154_v21 = vadd.f32 %v150_v19, %v140_v3 }
  0xae   : > { %v180_v23 = vadd.f32 %v177_v18, %v172_v20  ;;  %v165_v24 = vadd.f32 %v160_v9, %v154_v21 }
  0xb0   : > { %v173_v25 = vadd.f32 %v169_v22, %v165_v24  ;;  %184 = vrot.lane.b32.xlu0 %v180_v23, %s386_s20 }
  0xb2   : > { %v181_v26 = vadd.f32 %v176_v14, %v173_v25 }
  0xb4   : > { %186 = vrot.lane.b32.xlu1 %v181_v26, %s386_s20 }
 0x122   : > { %v185_v27 = vpop.permute.xlu0 %184 }
 0x123   : > { %191 = vst.msk [vmem:[%s136_s23] sm:$0xff] %vm190_vm2, %v185_v27 }
 0x126   : > { %v187_v28 = vpop.permute.xlu1 %186 }
 0x127   : > { %193 = vst.msk [vmem:[%s136_s23 + $0x8] sm:$0x3f] %vm192_vm3, %v187_v28 }
 0x128 PF: > { %p11_p9 = scmp.ge.s32.totalorder %s419_s11, 4   ;;  %s505_s6 = smov %s372_s7 }
 0x129   : > { %s506_s7 = smov %s376_s8  ;;  %s507_s8 = smov %s429_s14 }
 0x12a   : > { %s508_s9 = smov %s419_s11  ;;  %13 = sbr.rel (!%p11_p9) target bundleno = 3 (0x3), region = 64 }
 0x12f   :  { %215 = vsyncpa [#allocation3], 1 }
 0x130   :  { %217 = vsyncpa [#allocation3 + $0x1], 1 }

</bundles_post_ra>
